<compile_context>
chip_gen: v7x
topology: tpu7x:2x2x1
jax: 0.10.0
libtpu: 0.0.40
codegen_flags: <defaults>
</compile_context>

<pallas_src>
import functools

import numpy as np

import jax
import jax.numpy as jnp
from jax import lax
from jax.experimental import pallas as pl
from jax.experimental.pallas import tpu as pltpu


_LANE = 128        # pad num_boxes to a multiple of the TPU lane width
_MAX_TILE_I = 256  # sublane-side tile: bounds lane-sparse [TI,1] operand pressure
_MAX_TILE_J = 1024 # lane-side tile: wide unmasked int8 stores, long output DMAs


def _round_up(x, m):
    return ((x + m - 1) // m) * m


def _pick_tile(npad, max_tile):
    """Largest multiple of 128 that divides npad and is <= max_tile."""
    t = min(npad, max_tile)
    while npad % t:
        t -= _LANE
    return t


# ---------------------------------------------------------------------------
# Pallas kernel: pairwise-IoU match adjacency for one (batch, i-tile, j-tile).
# iou_threshold is a compile-time constant closed over via functools.partial.
# ---------------------------------------------------------------------------
def _iou_match_kernel(rows_ref, cols_ref, out_ref, *, iou_threshold):
    bi = rows_ref[0]                      # [TI, 4]  boxes, box-major
    bj = cols_ref[0]                      # [4, TJ]  same boxes, coordinate-major
    x1i, y1i = bi[:, 0:1], bi[:, 1:2]     # [TI, 1]
    x2i, y2i = bi[:, 2:3], bi[:, 3:4]
    x1j, y1j = bj[0:1, :], bj[1:2, :]     # [1, TJ]
    x2j, y2j = bj[2:3, :], bj[3:4, :]

    xx1 = jnp.maximum(x1i, x1j)           # broadcast -> [TI, TJ]
    yy1 = jnp.maximum(y1i, y1j)
    xx2 = jnp.minimum(x2i, x2j)
    yy2 = jnp.minimum(y2i, y2j)
    inter = jnp.maximum(xx2 - xx1, 0.0) * jnp.maximum(yy2 - yy1, 0.0)
    area_i = (x2i - x1i) * (y2i - y1i)    # [TI, 1]
    area_j = (x2j - x1j) * (y2j - y1j)    # [1, TJ]
    union = area_i + area_j - inter
    # divide-free: iou > thr  <=>  inter > thr * union   (union >= 0 for valid boxes)
    out_ref[0] = (inter > jnp.float32(iou_threshold) * union).astype(jnp.int8)


def pallas_iou_match_matrix(boxes, iou_threshold):
    """boxes: [B, N, 4] f32 -> adjacency [B, Np, Np] int8 (1 where IoU > thr)."""
    B, N, _ = boxes.shape
    npad = _round_up(N, _LANE)
    if npad != N:  # pad only when needed
        boxes = jnp.pad(boxes, ((0, 0), (0, npad - N), (0, 0)))
    rows = boxes                                   # [B, Np, 4]
    cols = jnp.transpose(boxes, (0, 2, 1))         # [B, 4, Np]  (XLA layout plumbing)

    tile_i = _pick_tile(npad, _MAX_TILE_I)
    tile_j = _pick_tile(npad, _MAX_TILE_J)
    # v7x megacore: keep >= 2 parallel grid steps even for single-batch single-tile
    # inputs (npad >= 128, so the halved tile stays a multiple of 32 for int8 tiling).
    if B * (npad // tile_i) * (npad // tile_j) < 2:
        tile_i //= 2
    grid = (B, npad // tile_i, npad // tile_j)

    kernel = functools.partial(_iou_match_kernel, iou_threshold=float(iou_threshold))
    return pl.pallas_call(
        kernel,
        out_shape=jax.ShapeDtypeStruct((B, npad, npad), jnp.int8),
        grid=grid,
        in_specs=[
            pl.BlockSpec((1, tile_i, 4), lambda b, i, j: (b, i, 0)),
            pl.BlockSpec((1, 4, tile_j), lambda b, i, j: (b, 0, j)),
        ],
        out_specs=pl.BlockSpec((1, tile_i, tile_j), lambda b, i, j: (b, i, j)),
        compiler_params=pltpu.CompilerParams(
            dimension_semantics=("parallel", "parallel", "parallel"),
            vmem_limit_bytes=32 * 1024 * 1024,
        ),
    )(rows, cols)


# ---------------------------------------------------------------------------
# Greedy NMS-match grouping (per batch, per class) on the adjacency matrix.
# ---------------------------------------------------------------------------
def _greedy_match(adj, scores_p, valid, n_steps):
    """adj: [Np, Np] int8; scores_p: [Np] (padded with -inf); valid: [Np] bool.

    Returns match_to [Np] int32 (keep index that suppressed j, else -1) and the
    descending-score permutation order [Np] int32.
    """
    npad = scores_p.shape[0]
    order = jnp.argsort(-scores_p).astype(jnp.int32)
    rank = jnp.zeros((npad,), jnp.int32).at[order].set(
        jnp.arange(npad, dtype=jnp.int32))

    def body(t, carry):
        suppressed, match_to = carry
        idx = order[t]
        is_keep = valid[idx] & jnp.logical_not(suppressed[idx])
        adj_row = adj[idx] != 0            # one int8 row -> bool per step (cheap)
        cand = adj_row & jnp.logical_not(suppressed) & (rank > t) & valid
        new_supp = cand & is_keep
        match_to = jnp.where(new_supp, idx, match_to)
        suppressed = suppressed | new_supp
        return suppressed, match_to

    init = (jnp.logical_not(valid), jnp.full((npad,), -1, jnp.int32))
    _, match_to = lax.fori_loop(0, n_steps, body, init)
    return match_to, order


@functools.partial(jax.jit, static_argnames=("iou_threshold",))
def _nms_match_device(boxes, scores, *, iou_threshold):
    boxes = boxes.astype(jnp.float32)
    scores = scores.astype(jnp.float32)
    _, N, _ = boxes.shape
    adj = pallas_iou_match_matrix(boxes, iou_threshold)       # [B, Np, Np] int8
    npad = adj.shape[-1]
    valid = jnp.arange(npad, dtype=jnp.int32) < N
    if npad != N:
        scores_p = jnp.pad(scores, ((0, 0), (0, 0), (0, npad - N)),
                           constant_values=-jnp.inf)
    else:
        scores_p = scores
    per_class = jax.vmap(lambda a, s: _greedy_match(a, s, valid, N),
                         in_axes=(None, 0))
    per_batch = jax.vmap(per_class, in_axes=(0, 0))
    match_to, order = per_batch(adj, scores_p)                 # [B, C, Np] each
    return match_to, order


def onnx_nms_match(boxes, scores, iou_threshold, score_threshold):
    iou_threshold = float(iou_threshold)
    score_threshold = float(score_threshold)
    boxes = jnp.asarray(boxes, jnp.float32)
    scores = jnp.asarray(scores, jnp.float32)
    match_to, order = _nms_match_device(boxes, scores, iou_threshold=iou_threshold)

    match_to = np.asarray(match_to)
    order = np.asarray(order)
    scores_np = np.asarray(scores)
    B, C, N = scores_np.shape
    npad = match_to.shape[-1]

    # TODO(synk): num_selected_indices is data-dependent, so this ragged stacking has
    # no static-shape Pallas equivalent; it mirrors the original Python loops on host.
    rows = []
    for b in range(B):
        for c in range(C):
            mt = match_to[b, c]
            rank = np.empty((npad,), np.int64)
            rank[order[b, c]] = np.arange(npad)
            sc = scores_np[b, c]
            js = [j for j in range(N)
                  if mt[j] >= 0 and sc[mt[j]] >= score_threshold]
            js.sort(key=lambda j: (rank[mt[j]], rank[j]))
            rows.extend([float(b), float(c), float(mt[j]), float(j)] for j in js)
    if not rows:
        return jnp.zeros((0, 4), jnp.float32)
    return jnp.asarray(np.asarray(rows, dtype=np.float32))


# ---------------------------------------------------------------------------
# Module-level API matching the PyTorch spec.
# ---------------------------------------------------------------------------
class ONNXNMSMatchOp:
    """JAX analog of mmdeploy's ONNXNMSMatchOp autograd.Function (forward only)."""

    @staticmethod
    def apply(boxes, scores, iou_threshold, score_threshold):
        return onnx_nms_match(boxes, scores, iou_threshold, score_threshold)


match_op = ONNXNMSMatchOp.apply


class test_ONNX_Match:
    def __init__(self):
        pass

    def forward(self, boxes, scores, iou_threshold, score_threshold):
        return match_op(boxes, scores, iou_threshold, score_threshold)

    __call__ = forward


# ---------------------------------------------------------------------------
# Pure NumPy reference replicating the original torch forward.
# ---------------------------------------------------------------------------
def _forward_ref(boxes, scores, iou_thr, score_thr):
    boxes = np.asarray(boxes, np.float32)
    scores = np.asarray(scores, np.float32)
    B, C, N = scores.shape
    rows = []
    for b in range(B):
        for c in range(C):
            bx = boxes[b]
            sc = scores[b, c]
            order = np.argsort(-sc)
            suppressed = np.zeros((N,), bool)
            for t in range(N):
                i = order[t]
                if suppressed[i]:
                    continue
                keep_ok = sc[i] >= score_thr
                for u in range(t + 1, N):
                    j = order[u]
                    if suppressed[j]:
                        continue
                    xx1 = max(bx[i, 0], bx[j, 0]); yy1 = max(bx[i, 1], bx[j, 1])
                    xx2 = min(bx[i, 2], bx[j, 2]); yy2 = min(bx[i, 3], bx[j, 3])
                    inter = max(xx2 - xx1, 0.0) * max(yy2 - yy1, 0.0)
                    ai = (bx[i, 2] - bx[i, 0]) * (bx[i, 3] - bx[i, 1])
                    aj = (bx[j, 2] - bx[j, 0]) * (bx[j, 3] - bx[j, 1])
                    union = ai + aj - inter
                    iou = inter / union if union > 0 else 0.0
                    if iou > iou_thr:
                        suppressed[j] = True
                        if keep_ok:
                            rows.append([b, c, i, j])
    return np.asarray(rows, np.float32).reshape(-1, 4)


if __name__ == "__main__":
    key = jax.random.PRNGKey(0)
    k1, k2, k3 = jax.random.split(key, 3)
    B, C, N = 2, 4, 16
    centers = jax.random.uniform(k1, (B, N, 2), minval=0.0, maxval=32.0)
    sizes = jax.random.uniform(k2, (B, N, 2), minval=4.0, maxval=16.0)
    boxes = jnp.concatenate([centers - 0.5 * sizes, centers + 0.5 * sizes], axis=-1)
    scores = jax.random.uniform(k3, (B, C, N), minval=0.0, maxval=1.0)
    iou_threshold = 0.1
    score_threshold = 0.05

    model = test_ONNX_Match()
    out = model(boxes, scores, iou_threshold, score_threshold)
    out = jax.block_until_ready(out)

    ref = _forward_ref(np.asarray(boxes), np.asarray(scores),
                       iou_threshold, score_threshold)
    out_np = np.asarray(out)
    assert out_np.ndim == 2 and out_np.shape[1] == 4
    assert out_np.shape == ref.shape, (out_np.shape, ref.shape)
    assert np.array_equal(out_np, ref)
    print("KERNEL_OK")
</pallas_src>

<mosaic_0001>
module attributes {stable_mosaic.version = 11 : i64} {
  func.func @_iou_match_kernel(%arg0: i32, %arg1: i32, %arg2: i32, %arg3: memref<1x128x4xf32, #tpu.memory_space<vmem>>, %arg4: memref<1x4x128xf32, #tpu.memory_space<vmem>>, %arg5: memref<1x128x128xi8, #tpu.memory_space<vmem>>) attributes {dimension_semantics = [#tpu.dimension_semantics<parallel>, #tpu.dimension_semantics<parallel>, #tpu.dimension_semantics<parallel>], iteration_bounds = array<i64: 2, 1, 1>, scalar_prefetch = 0 : i64, scratch_operands = 0 : i64, tpu.core_type = #tpu.core_type<tc>, window_params = [{transform_indices = @transform_0, window_bounds = array<i64: 1, 128, 4>}, {transform_indices = @transform_1, window_bounds = array<i64: 1, 4, 128>}, {transform_indices = @transform_2, window_bounds = array<i64: 1, 128, 128>}]} {
    %c0 = arith.constant 0 : index
    %c0_0 = arith.constant 0 : index
    %c0_1 = arith.constant 0 : index
    %0 = vector.load %arg3[%c0, %c0_0, %c0_1] : memref<1x128x4xf32, #tpu.memory_space<vmem>>, vector<1x128x4xf32>
    %1 = vector.shape_cast %0 : vector<1x128x4xf32> to vector<128x4xf32>
    %c0_2 = arith.constant 0 : index
    %c0_3 = arith.constant 0 : index
    %c0_4 = arith.constant 0 : index
    %2 = vector.load %arg4[%c0_2, %c0_3, %c0_4] : memref<1x4x128xf32, #tpu.memory_space<vmem>>, vector<1x4x128xf32>
    %3 = vector.shape_cast %2 : vector<1x4x128xf32> to vector<4x128xf32>
    %4 = vector.extract_strided_slice %1 {offsets = [0, 0], sizes = [128, 1], strides = [1, 1]} : vector<128x4xf32> to vector<128x1xf32>
    %5 = vector.extract_strided_slice %1 {offsets = [0, 1], sizes = [128, 1], strides = [1, 1]} : vector<128x4xf32> to vector<128x1xf32>
    %6 = vector.extract_strided_slice %1 {offsets = [0, 2], sizes = [128, 1], strides = [1, 1]} : vector<128x4xf32> to vector<128x1xf32>
    %7 = vector.extract_strided_slice %1 {offsets = [0, 3], sizes = [128, 1], strides = [1, 1]} : vector<128x4xf32> to vector<128x1xf32>
    %8 = vector.extract_strided_slice %3 {offsets = [0, 0], sizes = [1, 128], strides = [1, 1]} : vector<4x128xf32> to vector<1x128xf32>
    %9 = vector.extract_strided_slice %3 {offsets = [1, 0], sizes = [1, 128], strides = [1, 1]} : vector<4x128xf32> to vector<1x128xf32>
    %10 = vector.extract_strided_slice %3 {offsets = [2, 0], sizes = [1, 128], strides = [1, 1]} : vector<4x128xf32> to vector<1x128xf32>
    %11 = vector.extract_strided_slice %3 {offsets = [3, 0], sizes = [1, 128], strides = [1, 1]} : vector<4x128xf32> to vector<1x128xf32>
    %12 = vector.broadcast %4 : vector<128x1xf32> to vector<128x128xf32>
    %13 = vector.broadcast %8 : vector<1x128xf32> to vector<128x128xf32>
    %14 = arith.maximumf %12, %13 : vector<128x128xf32>
    %15 = vector.broadcast %5 : vector<128x1xf32> to vector<128x128xf32>
    %16 = vector.broadcast %9 : vector<1x128xf32> to vector<128x128xf32>
    %17 = arith.maximumf %15, %16 : vector<128x128xf32>
    %18 = vector.broadcast %6 : vector<128x1xf32> to vector<128x128xf32>
    %19 = vector.broadcast %10 : vector<1x128xf32> to vector<128x128xf32>
    %20 = arith.minimumf %18, %19 : vector<128x128xf32>
    %21 = vector.broadcast %7 : vector<128x1xf32> to vector<128x128xf32>
    %22 = vector.broadcast %11 : vector<1x128xf32> to vector<128x128xf32>
    %23 = arith.minimumf %21, %22 : vector<128x128xf32>
    %24 = arith.subf %20, %14 : vector<128x128xf32>
    %cst = arith.constant 0.000000e+00 : f32
    %25 = vector.broadcast %cst : f32 to vector<128x128xf32>
    %26 = arith.maximumf %24, %25 : vector<128x128xf32>
    %27 = arith.subf %23, %17 : vector<128x128xf32>
    %cst_5 = arith.constant 0.000000e+00 : f32
    %28 = vector.broadcast %cst_5 : f32 to vector<128x128xf32>
    %29 = arith.maximumf %27, %28 : vector<128x128xf32>
    %30 = arith.mulf %26, %29 : vector<128x128xf32>
    %31 = arith.subf %6, %4 : vector<128x1xf32>
    %32 = arith.subf %7, %5 : vector<128x1xf32>
    %33 = arith.mulf %31, %32 : vector<128x1xf32>
    %34 = arith.subf %10, %8 : vector<1x128xf32>
    %35 = arith.subf %11, %9 : vector<1x128xf32>
    %36 = arith.mulf %34, %35 : vector<1x128xf32>
    %37 = vector.broadcast %33 : vector<128x1xf32> to vector<128x128xf32>
    %38 = vector.broadcast %36 : vector<1x128xf32> to vector<128x128xf32>
    %39 = arith.addf %37, %38 : vector<128x128xf32>
    %40 = arith.subf %39, %30 : vector<128x128xf32>
    %cst_6 = arith.constant 1.000000e-01 : f32
    %41 = vector.broadcast %cst_6 : f32 to vector<128x128xf32>
    %42 = arith.mulf %41, %40 : vector<128x128xf32>
    %43 = arith.cmpf ogt, %30, %42 : vector<128x128xf32>
    %44 = arith.extui %43 : vector<128x128xi1> to vector<128x128xi8>
    %c0_7 = arith.constant 0 : index
    %c0_8 = arith.constant 0 : index
    %c0_9 = arith.constant 0 : index
    %45 = vector.load %arg5[%c0_7, %c0_8, %c0_9] : memref<1x128x128xi8, #tpu.memory_space<vmem>>, vector<1x128x128xi8>
    %46 = vector.shape_cast %45 : vector<1x128x128xi8> to vector<128x128xi8>
    %47 = vector.shape_cast %44 : vector<128x128xi8> to vector<1x128x128xi8>
    tpu.vector_store %arg5[%c0_7, %c0_8, %c0_9], %47 {strides = array<i32>} : memref<1x128x128xi8, #tpu.memory_space<vmem>>, vector<1x128x128xi8>,
    return
  }
  func.func @transform_0(%arg0: i32, %arg1: i32, %arg2: i32) -> (i32, i32, i32) {
    %c0_i32 = arith.constant 0 : i32
    %c0_i32_0 = arith.constant 0 : i32
    return %arg0, %arg1, %c0_i32 : i32, i32, i32
  }
  func.func @transform_1(%arg0: i32, %arg1: i32, %arg2: i32) -> (i32, i32, i32) {
    %c0_i32 = arith.constant 0 : i32
    %c0_i32_0 = arith.constant 0 : i32
    return %arg0, %c0_i32, %arg2 : i32, i32, i32
  }
  func.func @transform_2(%arg0: i32, %arg1: i32, %arg2: i32) -> (i32, i32, i32) {
    %c0_i32 = arith.constant 0 : i32
    return %arg0, %arg1, %arg2 : i32, i32, i32
  }
}

</mosaic_0001>

<bundles_post_ra>
// kernel: custom-call.4
= control target key start
LH: loop header
LB: loop body
LE: loop exit
PB: predicated region body
PF: predicated region fallthrough
CT: control target
= control target key end

     0   :  { %s6_s0 = inlined_call_operand.vmem [shape: s32[2,4,128], index: 0, kind: output, shape index: {}]  }

// kernel: _nms_match_device.1
= control target key start
LH: loop header
LB: loop body
LE: loop exit
PB: predicated region body
PF: predicated region fallthrough
CT: control target
= control target key end

     0   :  { %s1270_s9 = smov 0   ;;  %s1272_s10 = smov 0   ;;  %s1856_s0 = inlined_call_operand.vmem [shape: f32[2,128,4], index: 0, kind: input, shape index: {}]   ;;  %s1857_s1 = inlined_call_operand.vmem [shape: f32[2,4,128], index: 1, kind: input, shape index: {}]   ;;  %s1858_s2 = inlined_call_operand.vmem [shape: s8[2,128,128], index: 2, kind: output, shape index: {}]  }
   0x1   :  { %s1274_s11 = smov 0  }
   0x2 LB: > { %s31_s12 = sadd.s32 1, %s1243_s10  ;;  %p1176_p0 = scmp.ge.s32.totalorder %s1247_s11, 1  ;;  %s1247_s11 = sphi %s1274_s11, %s12_s11   ;;  %s1243_s10 = sphi %s1272_s10, %s1909_s10   ;;  %s1239_s9 = sphi %s1270_s9, %s1908_s9  }
   0x3   : > { %p33_p1 = scmp.ge.s32.totalorder %s31_s12, 2  ;;  %p156_p2 = scmp.lt.s32.totalorder %s1247_s11, 3 }
   0x5   : > { %s1911_s12 = smov (%p33_p1, %s31_s12), 0  ;;  %p157_p3 = pnand %p1176_p0, %p156_p2 }
   0x7   : > { %160 = sbr.rel (%p157_p3) target bundleno = 539 (0x21b), region = 28 }
   0xe   : > { %p197_p4 = scmp.lt.s32.totalorder %s1239_s9, 1  ;;  %v1859_v0 = vmov 0   ;;  %v1250_v17 = vmov 1   ;;  %v1861_v18 = vmov 2   ;;  %s1252_s17 = smov 2   ;;  %v1253_v19 = vmov 3  }
   0xf   : > { %1217 = vset.pattern.permute.xlu1 %v1859_v0  ;;  %1216 = vset.pattern.permute.xlu0 %v1859_v0  ;;  %s1254_s18 = smov 127  }
  0x10   : > { %s1913_s9 = smov (!%p197_p4, %s1239_s9), 1 }
  0x11   : > { %s1184_s13 = sshll.u32 %s1913_s9, 7  ;;  %s1179_s19 = sshll.u32 %s1913_s9, 2 }
  0x12   : > { %s204_s16 = scalar_lea.vmem %s1856_s0, %s1184_s13  ;;  %s212_s22 = scalar_lea.vmem %s1857_s1, %s1179_s19 }
  0x13   : > { %v1296_v1 = vld [vmem:[%s204_s16 + $0x10] sm:$0xff]  ;;  %v1298_v2 = vld [vmem:[%s204_s16] sm:$0xff]  ;;  %v1302_v3 = vld [vmem:[%s204_s16 + $0x18] sm:$0xff]  ;;  %s1185_s23 = sshll.u32 %s1913_s9, 5 }
  0x14   : > { %257 = vperm.xlu1 %1217, %v1296_v1   ;;  %247 = vperm.xlu0 %1216, %v1298_v2   ;;  %v1304_v4 = vld [vmem:[%s204_s16 + $0x8] sm:$0xff]  ;;  %v1310_v6 = vld [vmem:[%s204_s16 + $0x20] sm:$0xff]  ;;  %v1314_v7 = vld [vmem:[%s204_s16 + $0x38] sm:$0xff]  ;;  %s1796_s26 = scalar_lea.vmem %s1858_s2, %s1185_s23 }
  0x15   : > { %v1308_v5 = vld [vmem:[%s204_s16 + $0x28] sm:$0xff]  ;;  %v1316_v8 = vld [vmem:[%s204_s16 + $0x30] sm:$0xff]  ;;  %v1322_v10 = vld [vmem:[%s204_s16 + $0x40] sm:$0xff] }
  0x16   : > { %v1320_v9 = vld [vmem:[%s204_s16 + $0x48] sm:$0xff]  ;;  %v1326_v11 = vld [vmem:[%s204_s16 + $0x58] sm:$0xff]  ;;  %v1328_v12 = vld [vmem:[%s204_s16 + $0x50] sm:$0xff] }
  0x17   : > { %v1332_v13 = vld [vmem:[%s204_s16 + $0x68] sm:$0xff]  ;;  %v1334_v14 = vld [vmem:[%s204_s16 + $0x60] sm:$0xff]  ;;  %v1338_v15 = vld [vmem:[%s204_s16 + $0x78] sm:$0xff] }
  0x18   : > { %262 = vperm.xlu1 %1217, %v1302_v3   ;;  %252 = vperm.xlu0 %1216, %v1304_v4   ;;  %v1340_v16 = vld [vmem:[%s204_s16 + $0x70] sm:$0xff] }
  0x1c   : > { %272 = vperm.xlu1 %1217, %v1308_v5   ;;  %267 = vperm.xlu0 %1216, %v1310_v6  }
  0x20   : > { %282 = vperm.xlu1 %1217, %v1314_v7   ;;  %277 = vperm.xlu0 %1216, %v1316_v8  }
  0x24   : > { %292 = vperm.xlu1 %1217, %v1320_v9   ;;  %287 = vperm.xlu0 %1216, %v1322_v10  }
  0x28   : > { %302 = vperm.xlu1 %1217, %v1326_v11   ;;  %297 = vperm.xlu0 %1216, %v1328_v12  }
  0x2c   : > { %312 = vperm.xlu1 %1217, %v1332_v13   ;;  %307 = vperm.xlu0 %1216, %v1334_v14  }
  0x30   : > { %322 = vperm.xlu1 %1217, %v1338_v15   ;;  %317 = vperm.xlu0 %1216, %v1340_v16  }
  0x34   : > { %1219 = vset.pattern.permute.xlu1 %v1250_v17  ;;  %1218 = vset.pattern.permute.xlu0 %v1250_v17 }
  0x35   : > { %350 = vperm.xlu1 %1219, %v1304_v4   ;;  %346 = vperm.xlu0 %1218, %v1298_v2  }
  0x39   : > { %354 = vperm.xlu1 %1219, %v1296_v1   ;;  %358 = vperm.xlu0 %1218, %v1302_v3  }
  0x3d   : > { %362 = vperm.xlu1 %1219, %v1310_v6   ;;  %366 = vperm.xlu0 %1218, %v1308_v5  }
  0x41   : > { %370 = vperm.xlu1 %1219, %v1316_v8   ;;  %374 = vperm.xlu0 %1218, %v1314_v7  }
  0x45   : > { %378 = vperm.xlu1 %1219, %v1322_v10   ;;  %382 = vperm.xlu0 %1218, %v1320_v9  }
  0x49   : > { %386 = vperm.xlu1 %1219, %v1328_v12   ;;  %390 = vperm.xlu0 %1218, %v1326_v11  }
  0x4d   : > { %394 = vperm.xlu1 %1219, %v1334_v14   ;;  %398 = vperm.xlu0 %1218, %v1332_v13  }
  0x51   : > { %402 = vperm.xlu1 %1219, %v1340_v16   ;;  %406 = vperm.xlu0 %1218, %v1338_v15  }
  0x55   : > { %1220 = vset.pattern.permute.xlu1 %v1861_v18  ;;  %677 = vrot.lane.b32.xlu0 %v1298_v2, %s1252_s17 }
  0x56   : > { %430 = vperm.xlu1 %1220, %v1298_v2   ;;  %1221 = vset.pattern.permute.xlu0 %v1253_v19 }
  0x59   : > { %681 = vrot.lane.b32.xlu0 %v1296_v1, %s1252_s17 }
  0x5a   : > { %438 = vperm.xlu1 %1220, %v1296_v1  }
  0x5d   : > { %685 = vrot.lane.b32.xlu0 %v1310_v6, %s1252_s17 }
  0x5e   : > { %442 = vperm.xlu1 %1220, %v1302_v3  }
  0x61   : > { %689 = vrot.lane.b32.xlu0 %v1316_v8, %s1252_s17 }
  0x62   : > { %450 = vperm.xlu1 %1220, %v1308_v5  }
  0x65   : > { %693 = vrot.lane.b32.xlu0 %v1322_v10, %s1252_s17 }
  0x66   : > { %458 = vperm.xlu1 %1220, %v1314_v7  }
  0x69   : > { %697 = vrot.lane.b32.xlu0 %v1328_v12, %s1252_s17 }
  0x6a   : > { %466 = vperm.xlu1 %1220, %v1320_v9  }
  0x6d   : > { %701 = vrot.lane.b32.xlu0 %v1334_v14, %s1252_s17 }
  0x6e   : > { %474 = vperm.xlu1 %1220, %v1326_v11  }
  0x71   : > { %705 = vrot.lane.b32.xlu0 %v1340_v16, %s1252_s17 }
  0x72   : > { %482 = vperm.xlu1 %1220, %v1332_v13  }
  0x75   : > { %514 = vperm.xlu0 %1221, %v1298_v2  }
  0x76   : > { %679 = vrot.lane.b32.xlu1 %v1304_v4, %s1252_s17 }
  0x79   : > { %526 = vperm.xlu0 %1221, %v1302_v3  }
  0x7a   : > { %683 = vrot.lane.b32.xlu1 %v1302_v3, %s1252_s17 }
  0x7e   : > { %687 = vrot.lane.b32.xlu1 %v1308_v5, %s1252_s17 }
  0x82   : > { %691 = vrot.lane.b32.xlu1 %v1314_v7, %s1252_s17 }
  0x86   : > { %695 = vrot.lane.b32.xlu1 %v1320_v9, %s1252_s17 }
  0x8a   : > { %699 = vrot.lane.b32.xlu1 %v1326_v11, %s1252_s17 }
  0x8e   : > { %703 = vrot.lane.b32.xlu1 %v1332_v13, %s1252_s17 }
  0x92   : > { %707 = vrot.lane.b32.xlu1 %v1338_v15, %s1252_s17 }
  0x93   : > { %v1387_v20 = vpop.permute.xlu1 %257  ;;  %v1389_v21 = vpop.permute.xlu0 %247 }
  0x96   : > { %490 = vperm.xlu1 %1220, %v1338_v15  }
  0x97   : > { %v1392_v22 = vpop.permute.xlu1 %262  ;;  %v1394_v23 = vpop.permute.xlu0 %252 }
  0x98   : > { %1867 = vst [vmem:[#allocation2_spill] sm:$0xff] %v1394_v23 }
  0x9a   : > { %1222 = vset.pattern.permute.xlu1 %v1253_v19 }
  0x9b   : > { %v1396_v24 = vpop.permute.xlu1 %272  ;;  %518 = vperm.xlu1 %1222, %v1304_v4   ;;  %v1399_v25 = vpop.permute.xlu0 %267 }
  0x9c   : > { %1868 = vst [vmem:[#allocation3_spill] sm:$0xff] %v1399_v25 }
  0x9f   : > { %v1401_v26 = vpop.permute.xlu1 %282  ;;  %522 = vperm.xlu1 %1222, %v1296_v1   ;;  %v1404_v27 = vpop.permute.xlu0 %277 }
  0xa0   : > { %1869 = vst [vmem:[#allocation4_spill] sm:$0xff] %v1404_v27 }
  0xa3   : > { %v1406_v28 = vpop.permute.xlu1 %292  ;;  %530 = vperm.xlu1 %1222, %v1310_v6   ;;  %v1409_v29 = vpop.permute.xlu0 %287 }
  0xa4   : > { %1870 = vst [vmem:[#allocation5_spill] sm:$0xff] %v1409_v29 }
  0xa7   : > { %v1411_v30 = vpop.permute.xlu1 %302  ;;  %v1413_v31 = vpop.permute.xlu0 %297 }
  0xa8   : > { %1871 = vst [vmem:[#allocation6_spill] sm:$0xff] %v1413_v31 }
  0xab   : > { %v1415_v32 = vpop.permute.xlu1 %312  ;;  %v1417_v33 = vpop.permute.xlu0 %307 }
  0xac   : > { %1872 = vst [vmem:[#allocation7_spill] sm:$0xff] %v1417_v33 }
  0xaf   : > { %v1419_v34 = vpop.permute.xlu1 %322  ;;  %v1421_v35 = vpop.permute.xlu0 %317 }
  0xb0   : > { %1873 = vst [vmem:[#allocation8_spill] sm:$0xff] %v1421_v35 }
  0xb4   : > { %v1423_v36 = vpop.permute.xlu1 %350  ;;  %v1425_v37 = vpop.permute.xlu0 %346 }
  0xb5   : > { %1874 = vst [vmem:[#allocation9_spill] sm:$0xff] %v1423_v36 }
  0xb8   : > { %v1427_v38 = vpop.permute.xlu1 %354  ;;  %v1429_v39 = vpop.permute.xlu0 %358 }
  0xbc   : > { %v1431_v40 = vpop.permute.xlu1 %362  ;;  %v1433_v41 = vpop.permute.xlu0 %366 }
  0xbd   : > { %1875 = vst [vmem:[#allocation10_spill] sm:$0xff] %v1431_v40 }
  0xc0   : > { %v1435_v42 = vpop.permute.xlu1 %370  ;;  %v1437_v43 = vpop.permute.xlu0 %374 }
  0xc1   : > { %1876 = vst [vmem:[#allocation11_spill] sm:$0xff] %v1435_v42 }
  0xc4   : > { %v1439_v44 = vpop.permute.xlu1 %378  ;;  %v1441_v45 = vpop.permute.xlu0 %382 }
  0xc5   : > { %1877 = vst [vmem:[#allocation12_spill] sm:$0xff] %v1439_v44 }
  0xc8   : > { %v1443_v46 = vpop.permute.xlu1 %386  ;;  %v1445_v47 = vpop.permute.xlu0 %390 }
  0xc9   : > { %1878 = vst [vmem:[#allocation13_spill] sm:$0xff] %v1443_v46 }
  0xcc   : > { %v1447_v48 = vpop.permute.xlu1 %394  ;;  %v1449_v49 = vpop.permute.xlu0 %398 }
  0xcd   : > { %1879 = vst [vmem:[#allocation14_spill] sm:$0xff] %v1447_v48 }
  0xd0   : > { %v1451_v50 = vpop.permute.xlu1 %402  ;;  %v1453_v51 = vpop.permute.xlu0 %406 }
  0xd1   : > { %1880 = vst [vmem:[#allocation15_spill] sm:$0xff] %v1451_v50 }
  0xd4   : > { %v678_v52 = vpop.permute.xlu0 %677 }
  0xd5   : > { %v1456_v53 = vsub.f32 %v1298_v2, %v678_v52  ;;  %v431_v54 = vpop.permute.xlu1 %430 }
  0xd7   : > { %757 = vrot.lane.b32.xlu0 %v1456_v53, %s1254_s18 }
  0xd8   : > { %v682_v55 = vpop.permute.xlu0 %681 }
  0xd9   : > { %v1461_v56 = vsub.f32 %v1296_v1, %v682_v55  ;;  %v1463_v57 = vpop.permute.xlu1 %438  ;;  %v325_v1 = vlaneseq }
  0xdb   : > { %761 = vrot.lane.b32.xlu0 %v1461_v56, %s1254_s18  ;;  %v1485_v52 = vshrl.u32 %v325_v1, 7  ;;  %v1500_v1 = vld [vmem:[%s212_s22] sm:$0xf] }
  0xdc   : > { %v686_v58 = vpop.permute.xlu0 %685  ;;  %1882 = vst [vmem:[#allocation17_spill] sm:$0xff] %v1500_v1 }
  0xdd   : > { %v1468_v59 = vsub.f32 %v1310_v6, %v686_v58  ;;  %v443_v60 = vpop.permute.xlu1 %442  ;;  %1881 = vst [vmem:[#allocation16_spill] sm:$0xff] %v1485_v52  ;;  %v1863_v58 = vsub.s32 2, %v1485_v52  ;;  %v327_v18 = vsub.s32 0, %v1485_v52  ;;  %v579_v27 = vsub.s32 3, %v1485_v52 }
  0xde   : > { %v411_v42 = vsub.s32 1, %v1485_v52 }
  0xdf   : > { %765 = vrot.lane.b32.xlu0 %v1468_v59, %s1254_s18  ;;  %v1506_v44 = vrot.slane %v1500_v1, %v1863_v58  ;;  %v1518_v25 = vrot.slane %v1500_v1, %v327_v18  ;;  %v1527_v23 = vrot.slane %v1500_v1, %v579_v27 }
  0xe0   : > { %v690_v61 = vpop.permute.xlu0 %689  ;;  %v1532_v50 = vrot.slane %v1500_v1, %v411_v42 }
  0xe1   : > { %v1473_v62 = vsub.f32 %v1316_v8, %v690_v61  ;;  %v1475_v63 = vpop.permute.xlu1 %450  ;;  %v497_v36 = vmin.f32 %v431_v54, %v1506_v44  ;;  %v329_v52 = vmax.f32 %v1389_v21, %v1518_v25  ;;  %v500_v35 = vmin.f32 %v443_v60, %v1506_v44 }
  0xe2   : > { %v413_v54 = vmax.f32 %v1425_v37, %v1532_v50  ;;  %v332_v21 = vmax.f32 %v1392_v22, %v1518_v25  ;;  %v416_v1 = vmax.f32 %v1429_v39, %v1532_v50 }
  0xe3   : > { %769 = vrot.lane.b32.xlu0 %v1473_v62, %s1254_s18 }
  0xe4   : > { %v694_v2 = vpop.permute.xlu0 %693  ;;  %v600_v60 = vsub.f32 %v500_v35, %v332_v21 }
  0xe5   : > { %v1480_v17 = vsub.f32 %v1322_v10, %v694_v2  ;;  %v1482_v19 = vpop.permute.xlu1 %458 }
  0xe6   : > { %v616_v39 = vmax.f32 %v600_v60, 0.0 }
  0xe7   : > { %773 = vrot.lane.b32.xlu0 %v1480_v17, %s1254_s18 }
  0xe8   : > { %v698_v55 = vpop.permute.xlu0 %697 }
  0xe9   : > { %v1494_v61 = vsub.f32 %v1328_v12, %v698_v55  ;;  %v1496_v2 = vpop.permute.xlu1 %466 }
  0xeb   : > { %777 = vrot.lane.b32.xlu0 %v1494_v61, %s1254_s18 }
  0xec   : > { %v702_v0 = vpop.permute.xlu0 %701 }
  0xed   : > { %v1509_v29 = vsub.f32 %v1334_v14, %v702_v0  ;;  %v1511_v55 = vpop.permute.xlu1 %474 }
  0xef   : > { %781 = vrot.lane.b32.xlu0 %v1509_v29, %s1254_s18 }
  0xf0   : > { %v706_v40 = vpop.permute.xlu0 %705 }
  0xf1   : > { %v1522_v58 = vsub.f32 %v1340_v16, %v706_v40  ;;  %v1524_v0 = vpop.permute.xlu1 %482  ;;  %v597_v40 = vsub.f32 %v497_v36, %v329_v52 }
  0xf3   : > { %785 = vrot.lane.b32.xlu0 %v1522_v58, %s1254_s18  ;;  %v613_v37 = vmax.f32 %v597_v40, 0.0 }
  0xf4   : > { %v515_v18 = vpop.permute.xlu0 %514 }
  0xf5   : > { %v581_v48 = vmin.f32 %v515_v18, %v1527_v23  ;;  %v680_v27 = vpop.permute.xlu1 %679 }
  0xf6   : > { %v1541_v33 = vsub.f32 %v1304_v4, %v680_v27 }
  0xf7   : > { %v629_v42 = vsub.f32 %v581_v48, %v413_v54  ;;  %534 = vperm.xlu0 %1221, %v1308_v5  }
  0xf8   : > { %759 = vrot.lane.b32.xlu1 %v1541_v33, %s1254_s18  ;;  %v527_v36 = vpop.permute.xlu0 %526 }
  0xf9   : > { %v645_v52 = vmax.f32 %v629_v42, 0.0  ;;  %v584_v18 = vmin.f32 %v527_v36, %v1527_v23  ;;  %v684_v27 = vpop.permute.xlu1 %683 }
  0xfa   : > { %v1552_v46 = vsub.f32 %v1302_v3, %v684_v27 }
  0xfb   : > { %v632_v22 = vsub.f32 %v584_v18, %v416_v1  ;;  %542 = vperm.xlu0 %1221, %v1314_v7   ;;  %v1555_v48 = vmul.f32 %v645_v52, %v613_v37 }
  0xfc   : > { %763 = vrot.lane.b32.xlu1 %v1552_v46, %s1254_s18 }
  0xfd   : > { %v648_v54 = vmax.f32 %v632_v22, 0.0  ;;  %v688_v31 = vpop.permute.xlu1 %687 }
  0xfe   : > { %v1560_v35 = vsub.f32 %v1308_v5, %v688_v31 }
  0xff   : > { %550 = vperm.xlu0 %1221, %v1320_v9   ;;  %v1563_v40 = vmul.f32 %v648_v54, %v616_v39 }
 0x100   : > { %767 = vrot.lane.b32.xlu1 %v1560_v35, %s1254_s18 }
 0x101   : > { %v692_v3 = vpop.permute.xlu1 %691 }
 0x102   : > { %v1568_v1 = vsub.f32 %v1314_v7, %v692_v3 }
 0x103   : > { %558 = vperm.xlu0 %1221, %v1326_v11  }
 0x104   : > { %771 = vrot.lane.b32.xlu1 %v1568_v1, %s1254_s18 }
 0x105   : > { %v696_v21 = vpop.permute.xlu1 %695 }
 0x106   : > { %v1574_v5 = vsub.f32 %v1320_v9, %v696_v21  ;;  %v1883_v9 = vmov 2  }
 0x107   : > { %566 = vperm.xlu0 %1221, %v1332_v13  }
 0x108   : > { %775 = vrot.lane.b32.xlu1 %v1574_v5, %s1254_s18 }
 0x109   : > { %v700_v31 = vpop.permute.xlu1 %699 }
 0x10a   : > { %v1580_v42 = vsub.f32 %v1326_v11, %v700_v31 }
 0x10b   : > { %574 = vperm.xlu0 %1221, %v1338_v15  }
 0x10c   : > { %779 = vrot.lane.b32.xlu1 %v1580_v42, %s1254_s18 }
 0x10d   : > { %v704_v7 = vpop.permute.xlu1 %703 }
 0x10e   : > { %v1586_v36 = vsub.f32 %v1332_v13, %v704_v7 }
 0x10f   : > { %1223 = vset.pattern.permute.xlu0 %v1883_v9 }
 0x110   : > { %783 = vrot.lane.b32.xlu1 %v1586_v36, %s1254_s18  ;;  %434 = vperm.xlu0 %1223, %v1304_v4   ;;  %v499_v4 = vmin.f32 %v1463_v57, %v1506_v44 }
 0x111   : > { %v708_v37 = vpop.permute.xlu1 %707 }
 0x112   : > { %v1593_v11 = vsub.f32 %v1338_v15, %v708_v37  ;;  %v331_v15 = vmax.f32 %v1387_v20, %v1518_v25 }
 0x114   : > { %787 = vrot.lane.b32.xlu1 %v1593_v11, %s1254_s18  ;;  %446 = vperm.xlu0 %1223, %v1310_v6   ;;  %v415_v6 = vmax.f32 %v1427_v38, %v1532_v50  ;;  %v599_v18 = vsub.f32 %v499_v4, %v331_v15 }
 0x115   : > { %v1598_v60 = vpop.permute.xlu1 %490 }
 0x116   : > { %v615_v57 = vmax.f32 %v599_v18, 0.0 }
 0x118   : > { %538 = vperm.xlu1 %1222, %v1316_v8   ;;  %454 = vperm.xlu0 %1223, %v1316_v8  }
 0x11a   : > { %v1602_v13 = vpop.permute.xlu1 %518 }
 0x11c   : > { %546 = vperm.xlu1 %1222, %v1322_v10   ;;  %462 = vperm.xlu0 %1223, %v1322_v10  }
 0x11e   : > { %v523_v52 = vpop.permute.xlu1 %522 }
 0x11f   : > { %v583_v27 = vmin.f32 %v523_v52, %v1527_v23 }
 0x120   : > { %554 = vperm.xlu1 %1222, %v1328_v12   ;;  %470 = vperm.xlu0 %1223, %v1328_v12  }
 0x121   : > { %v631_v8 = vsub.f32 %v583_v27, %v415_v6 }
 0x123   : > { %v647_v22 = vmax.f32 %v631_v8, 0.0 }
 0x124   : > { %562 = vperm.xlu1 %1222, %v1334_v14   ;;  %478 = vperm.xlu0 %1223, %v1334_v14   ;;  %v1624_v14 = vpop.permute.xlu1 %530 }
 0x125   : > { %v1617_v10 = vmul.f32 %v647_v22, %v615_v57 }
 0x128   : > { %570 = vperm.xlu1 %1222, %v1340_v16   ;;  %486 = vperm.xlu0 %1223, %v1340_v16  }
 0x12c   : > { %1224 = vset.pattern.permute.xlu1 %v1883_v9 }
 0x149   : > { %v758_v20 = vpop.permute.xlu0 %757 }
 0x14a   : > { %v805_v38 = vmul.f32 %v758_v20, %v1456_v53 }
 0x14c   : > { %831 = vperm.xlu1 %1224, %v805_v38  }
 0x14d   : > { %v762_v12 = vpop.permute.xlu0 %761 }
 0x14e   : > { %v807_v39 = vmul.f32 %v762_v12, %v1461_v56  ;;  %v502_v56 = vmin.f32 %v1475_v63, %v1506_v44  ;;  %v418_v63 = vmax.f32 %v1433_v41, %v1532_v50  ;;  %v506_v41 = vmin.f32 %v1496_v2, %v1506_v44 }
 0x14f   : > { %v422_v2 = vmax.f32 %v1441_v45, %v1532_v50 }
 0x150   : > { %841 = vperm.xlu1 %1224, %v807_v39  }
 0x151   : > { %v766_v54 = vpop.permute.xlu0 %765 }
 0x152   : > { %v809_v4 = vmul.f32 %v766_v54, %v1468_v59 }
 0x155   : > { %v770_v3 = vpop.permute.xlu0 %769 }
 0x156   : > { %v811_v6 = vmul.f32 %v770_v3, %v1473_v62  ;;  %v338_v3 = vmax.f32 %v1406_v28, %v1518_v25 }
 0x159   : > { %v774_v21 = vpop.permute.xlu0 %773 }
 0x15a   : > { %v813_v57 = vmul.f32 %v774_v21, %v1480_v17 }
 0x15d   : > { %v778_v31 = vpop.permute.xlu0 %777 }
 0x161   : > { %v782_v16 = vpop.permute.xlu0 %781 }
 0x165   : > { %v786_v15 = vpop.permute.xlu0 %785 }
 0x16a   : > { %v760_v7 = vpop.permute.xlu1 %759 }
 0x16b   : > { %v806_v37 = vmul.f32 %v760_v7, %v1541_v33  ;;  %v334_v33 = vmax.f32 %v1396_v24, %v1518_v25  ;;  %v336_v24 = vmax.f32 %v1401_v26, %v1518_v25 }
 0x16d   : > { %836 = vperm.xlu0 %1223, %v806_v37   ;;  %v602_v27 = vsub.f32 %v502_v56, %v334_v33  ;;  %v606_v37 = vsub.f32 %v506_v41, %v338_v3  ;;  %v340_v56 = vmax.f32 %v1411_v30, %v1518_v25  ;;  %v819_v33 = vmul.f32 %v786_v15, %v1522_v58 }
 0x16e   : > { %v764_v9 = vpop.permute.xlu1 %763 }
 0x16f   : > { %v808_v53 = vmul.f32 %v764_v9, %v1552_v46  ;;  %v504_v46 = vmin.f32 %v1482_v19, %v1506_v44  ;;  %v420_v19 = vmax.f32 %v1437_v43, %v1532_v50  ;;  %v618_v20 = vmax.f32 %v602_v27, 0.0 }
 0x170   : > { %v817_v9 = vmul.f32 %v782_v16, %v1509_v29  ;;  %v510_v29 = vmin.f32 %v1524_v0, %v1506_v44  ;;  %v426_v0 = vmax.f32 %v1449_v49, %v1532_v50  ;;  %v428_v49 = vmax.f32 %v1453_v51, %v1532_v50 }
 0x171   : > { %846 = vperm.xlu1 %1224, %v808_v53   ;;  %851 = vperm.xlu0 %1223, %v809_v4   ;;  %v604_v38 = vsub.f32 %v504_v46, %v336_v24  ;;  %v344_v24 = vmax.f32 %v1419_v34, %v1518_v25 }
 0x172   : > { %v768_v52 = vpop.permute.xlu1 %767 }
 0x173   : > { %v810_v18 = vmul.f32 %v768_v52, %v1560_v35  ;;  %v620_v7 = vmax.f32 %v604_v38, 0.0 }
 0x175   : > { %856 = vperm.xlu1 %1224, %v810_v18   ;;  %861 = vperm.xlu0 %1223, %v811_v6   ;;  %v622_v6 = vmax.f32 %v606_v37, 0.0 }
 0x176   : > { %v772_v59 = vpop.permute.xlu1 %771  ;;  %v535_v8 = vpop.permute.xlu0 %534 }
 0x177   : > { %v812_v62 = vmul.f32 %v772_v59, %v1568_v1  ;;  %v586_v35 = vmin.f32 %v535_v8, %v1527_v23  ;;  %v815_v1 = vmul.f32 %v778_v31, %v1494_v61  ;;  %v508_v61 = vmin.f32 %v1511_v55, %v1506_v44 }
 0x178   : > { %v424_v55 = vmax.f32 %v1445_v47, %v1532_v50  ;;  %v342_v59 = vmax.f32 %v1415_v32, %v1518_v25 }
 0x179   : > { %v634_v22 = vsub.f32 %v586_v35, %v418_v63  ;;  %866 = vperm.xlu1 %1224, %v812_v62   ;;  %871 = vperm.xlu0 %1223, %v813_v57   ;;  %v608_v18 = vsub.f32 %v508_v61, %v340_v56  ;;  %v1884_v61 = vld [vmem:[#allocation6_spill] sm:$0xff] }
 0x17a   : > { %v776_v12 = vpop.permute.xlu1 %775  ;;  %v543_v17 = vpop.permute.xlu0 %542  ;;  %v610_v57 = vsub.f32 %v510_v29, %v342_v59 }
 0x17b   : > { %v650_v39 = vmax.f32 %v634_v22, 0.0  ;;  %v814_v54 = vmul.f32 %v776_v12, %v1574_v5  ;;  %v588_v26 = vmin.f32 %v543_v17, %v1527_v23  ;;  %v624_v63 = vmax.f32 %v608_v18, 0.0 }
 0x17c   : > { %v626_v38 = vmax.f32 %v610_v57, 0.0  ;;  %v1889_v57 = vld [vmem:[#allocation15_spill] sm:$0xff] }
 0x17d   : > { %v636_v21 = vsub.f32 %v588_v26, %v420_v19  ;;  %876 = vperm.xlu1 %1224, %v814_v54   ;;  %881 = vperm.xlu0 %1223, %v815_v1   ;;  %v1653_v43 = vmul.f32 %v650_v39, %v618_v20 }
 0x17e   : > { %v780_v31 = vpop.permute.xlu1 %779  ;;  %v551_v5 = vpop.permute.xlu0 %550 }
 0x17f   : > { %v652_v4 = vmax.f32 %v636_v21, 0.0  ;;  %v816_v28 = vmul.f32 %v780_v31, %v1580_v42  ;;  %v590_v53 = vmin.f32 %v551_v5, %v1527_v23  ;;  %v339_v31 = vmax.f32 %v1884_v61, %v1518_v25  ;;  %v1885_v5 = vld [vmem:[#allocation13_spill] sm:$0xff]  ;;  %v1891_v61 = vld [vmem:[#allocation16_spill] sm:$0xff] }
 0x181   : > { %v638_v52 = vsub.f32 %v590_v53, %v422_v2  ;;  %886 = vperm.xlu1 %1224, %v816_v28   ;;  %891 = vperm.xlu0 %1223, %v817_v9   ;;  %v1664_v45 = vmul.f32 %v652_v4, %v620_v7  ;;  %v423_v9 = vmax.f32 %v1885_v5, %v1532_v50 }
 0x182   : > { %v784_v16 = vpop.permute.xlu1 %783  ;;  %v559_v42 = vpop.permute.xlu0 %558 }
 0x183   : > { %v654_v27 = vmax.f32 %v638_v52, 0.0  ;;  %v818_v30 = vmul.f32 %v784_v16, %v1586_v36  ;;  %v592_v46 = vmin.f32 %v559_v42, %v1527_v23  ;;  %v512_v36 = vmin.f32 %v1598_v60, %v1506_v44  ;;  %v1886_v52 = vld [vmem:[#allocation7_spill] sm:$0xff] }
 0x185   : > { %v640_v8 = vsub.f32 %v592_v46, %v424_v55  ;;  %896 = vperm.xlu1 %1224, %v818_v30   ;;  %901 = vperm.xlu0 %1223, %v819_v33   ;;  %v1675_v47 = vmul.f32 %v654_v27, %v622_v6  ;;  %v612_v41 = vsub.f32 %v512_v36, %v344_v24  ;;  %v1887_v6 = vld [vmem:[#allocation14_spill] sm:$0xff] }
 0x186   : > { %v788_v62 = vpop.permute.xlu1 %787  ;;  %v567_v58 = vpop.permute.xlu0 %566  ;;  %v341_v55 = vmax.f32 %v1886_v52, %v1518_v25  ;;  %v425_v18 = vmax.f32 %v1887_v6, %v1532_v50  ;;  %v1894_v52 = vld [vmem:[#allocation9_spill] sm:$0xff]  ;;  %v585_v6 = vmin.f32 %v1624_v14, %v1527_v23 }
 0x187   : > { %v656_v15 = vmax.f32 %v640_v8, 0.0  ;;  %v820_v35 = vmul.f32 %v788_v62, %v1593_v11  ;;  %v594_v32 = vmin.f32 %v567_v58, %v1527_v23  ;;  %v628_v1 = vmax.f32 %v612_v41, 0.0 }
 0x188   : > { %v427_v62 = vmax.f32 %v1889_v57, %v1532_v50 }
 0x189   : > { %v642_v22 = vsub.f32 %v594_v32, %v426_v0  ;;  %906 = vperm.xlu1 %1224, %v820_v35   ;;  %v1685_v19 = vmul.f32 %v656_v15, %v624_v63  ;;  %v1888_v0 = vld [vmem:[#allocation8_spill] sm:$0xff] }
 0x18a   : > { %v575_v20 = vpop.permute.xlu0 %574  ;;  %v343_v63 = vmax.f32 %v1888_v0, %v1518_v25 }
 0x18b   : > { %v658_v12 = vmax.f32 %v642_v22, 0.0  ;;  %v596_v60 = vmin.f32 %v575_v20, %v1527_v23 }
 0x18d   : > { %v644_v17 = vsub.f32 %v596_v60, %v428_v49  ;;  %v1690_v11 = vmul.f32 %v658_v12, %v626_v38  ;;  %v1890_v60 = vld [vmem:[#allocation17_spill] sm:$0xff] }
 0x18f   : > { %v660_v39 = vmax.f32 %v644_v17, 0.0  ;;  %v435_v54 = vpop.permute.xlu0 %434  ;;  %v822_v17 = vrot.slane %v1890_v60, 6 }
 0x191   : > { %v1692_v34 = vmul.f32 %v660_v39, %v628_v1  ;;  %v824_v1 = vsub.f32 %v1890_v60, %v822_v17 }
 0x193   : > { %v447_v26 = vpop.permute.xlu0 %446  ;;  %v826_v39 = vrot.slane %v824_v1, 1 }
 0x197   : > { %v1694_v3 = vpop.permute.xlu1 %538  ;;  %v1696_v21 = vpop.permute.xlu0 %454 }
 0x198   : > { %v503_v14 = vmin.f32 %v1696_v21, %v1506_v44 }
 0x19b   : > { %v1698_v51 = vpop.permute.xlu1 %546  ;;  %v1700_v2 = vpop.permute.xlu0 %462 }
 0x19c   : > { %v589_v21 = vmin.f32 %v1698_v51, %v1527_v23 }
 0x19f   : > { %v555_v7 = vpop.permute.xlu1 %554  ;;  %v471_v37 = vpop.permute.xlu0 %470 }
 0x1a0   : > { %v591_v4 = vmin.f32 %v555_v7, %v1527_v23  ;;  %v507_v28 = vmin.f32 %v471_v37, %v1506_v44  ;;  %v828_v7 = vmul.f32 %v826_v39, %v824_v1  ;;  %v498_v37 = vmin.f32 %v435_v54, %v1506_v44  ;;  %v1899_v39 = vld [vmem:[#allocation5_spill] sm:$0xff] }
 0x1a2   : > { %v639_v53 = vsub.f32 %v591_v4, %v423_v9  ;;  %v607_v56 = vsub.f32 %v507_v28, %v339_v31  ;;  %v1892_v31 = vsub.s32 2, %v1891_v61  ;;  %v1893_v4 = vld [vmem:[#allocation2_spill] sm:$0xff] }
 0x1a3   : > { %v563_v29 = vpop.permute.xlu1 %562  ;;  %v479_v16 = vpop.permute.xlu0 %478  ;;  %v330_v28 = vmax.f32 %v1893_v4, %v1518_v25 }
 0x1a4   : > { %v655_v42 = vmax.f32 %v639_v53, 0.0  ;;  %v623_v33 = vmax.f32 %v607_v56, 0.0  ;;  %v593_v27 = vmin.f32 %v563_v29, %v1527_v23  ;;  %v509_v30 = vmin.f32 %v479_v16, %v1506_v44 }
 0x1a5   : > { %v1731_v5 = vrot.slane %v828_v7, %v1892_v31  ;;  %v582_v53 = vmin.f32 %v1602_v13, %v1527_v23  ;;  %v501_v56 = vmin.f32 %v447_v26, %v1506_v44  ;;  %v598_v54 = vsub.f32 %v498_v37, %v330_v28  ;;  %v1900_v37 = vld [vmem:[#allocation12_spill] sm:$0xff] }
 0x1a6   : > { %v641_v46 = vsub.f32 %v593_v27, %v425_v18  ;;  %v609_v59 = vsub.f32 %v509_v30, %v341_v55  ;;  %v1714_v8 = vmul.f32 %v655_v42, %v623_v33  ;;  %v414_v55 = vmax.f32 %v1894_v52, %v1532_v50  ;;  %v1895_v18 = vld [vmem:[#allocation3_spill] sm:$0xff]  ;;  %v1896_v42 = vld [vmem:[#allocation10_spill] sm:$0xff] }
 0x1a7   : > { %v571_v58 = vpop.permute.xlu1 %570  ;;  %v487_v36 = vpop.permute.xlu0 %486  ;;  %v333_v29 = vmax.f32 %v1895_v18, %v1518_v25  ;;  %v417_v33 = vmax.f32 %v1896_v42, %v1532_v50  ;;  %v614_v26 = vmax.f32 %v598_v54, 0.0  ;;  %v337_v7 = vmax.f32 %v1899_v39, %v1518_v25 }
 0x1a8   : > { %v657_v15 = vmax.f32 %v641_v46, 0.0  ;;  %v625_v35 = vmax.f32 %v609_v59, 0.0  ;;  %v595_v32 = vmin.f32 %v571_v58, %v1527_v23  ;;  %v511_v24 = vmin.f32 %v487_v36, %v1506_v44  ;;  %v1898_v36 = vld [vmem:[#allocation4_spill] sm:$0xff] }
 0x1a9   : > { %v630_v27 = vsub.f32 %v582_v53, %v414_v55  ;;  %v601_v30 = vsub.f32 %v501_v56, %v333_v29  ;;  %v633_v46 = vsub.f32 %v585_v6, %v417_v33  ;;  %v587_v59 = vmin.f32 %v1694_v3, %v1527_v23 }
 0x1aa   : > { %v643_v22 = vsub.f32 %v595_v32, %v427_v62  ;;  %v611_v49 = vsub.f32 %v511_v24, %v343_v63  ;;  %v1722_v20 = vmul.f32 %v657_v15, %v625_v35  ;;  %v1897_v63 = vld [vmem:[#allocation11_spill] sm:$0xff]  ;;  %v335_v15 = vmax.f32 %v1898_v36, %v1518_v25 }
 0x1ab   : > { %v419_v57 = vmax.f32 %v1897_v63, %v1532_v50  ;;  %v646_v62 = vmax.f32 %v630_v27, 0.0  ;;  %v617_v35 = vmax.f32 %v601_v30, 0.0  ;;  %v649_v24 = vmax.f32 %v633_v46, 0.0 }
 0x1ac   : > { %v659_v38 = vmax.f32 %v643_v22, 0.0  ;;  %v627_v41 = vmax.f32 %v611_v49, 0.0  ;;  %v421_v61 = vmax.f32 %v1900_v37, %v1532_v50  ;;  %v1903_v63 = vmov 0  }
 0x1ad   : > { %v635_v22 = vsub.f32 %v587_v59, %v419_v57  ;;  %v662_v49 = vmul.f32 %v646_v62, %v614_v26 }
 0x1ae   : > { %v1724_v12 = vmul.f32 %v659_v38, %v627_v41  ;;  %v603_v38 = vsub.f32 %v503_v14, %v335_v15  ;;  %v505_v41 = vmin.f32 %v1700_v2, %v1506_v44  ;;  %v637_v2 = vsub.f32 %v589_v21, %v421_v61 }
 0x1af   : > { %v651_v28 = vmax.f32 %v635_v22, 0.0 }
 0x1b0   : > { %v619_v44 = vmax.f32 %v603_v38, 0.0  ;;  %v605_v56 = vsub.f32 %v505_v41, %v337_v7  ;;  %v653_v42 = vmax.f32 %v637_v2, 0.0 }
 0x1b2   : > { %v621_v33 = vmax.f32 %v605_v56, 0.0 }
 0x1cb   : > { %v832_v9 = vpop.permute.xlu1 %831 }
 0x1cc   : > { %v913_v16 = vadd.f32 %v1731_v5, %v832_v9  ;;  %v665_v9 = vmul.f32 %v649_v24, %v617_v35 }
 0x1ce   : > { %v929_v0 = vsub.f32 %v913_v16, %v1555_v48 }
 0x1cf   : > { %v842_v13 = vpop.permute.xlu1 %841 }
 0x1d0   : > { %v915_v58 = vadd.f32 %v1731_v5, %v842_v13  ;;  %v945_v60 = vmul.f32 0.1, %v929_v0 }
 0x1d2   : > { %v931_v17 = vsub.f32 %v915_v58, %v1617_v10  ;;  %vm961_vm0 = vcmp.gt.f32.partialorder %v1555_v48, %v945_v60  ;;  %v667_v48 = vmul.f32 %v651_v28, %v619_v44 }
 0x1d4   : > { %v947_v52 = vmul.f32 0.1, %v931_v17 }
 0x1d6   : > { %vm963_vm3 = vcmp.gt.f32.partialorder %v1617_v10, %v947_v52  ;;  %v669_v10 = vmul.f32 %v653_v42, %v621_v33 }
 0x1ec   : > { %v837_v32 = vpop.permute.xlu0 %836 }
 0x1ed   : > { %v914_v3 = vadd.f32 %v1731_v5, %v837_v32 }
 0x1ef   : > { %v930_v1 = vsub.f32 %v914_v3, %v662_v49 }
 0x1f0   : > { %v847_v31 = vpop.permute.xlu1 %846  ;;  %v852_v4 = vpop.permute.xlu0 %851 }
 0x1f1   : > { %v946_v53 = vmul.f32 0.1, %v930_v1  ;;  %v916_v23 = vadd.f32 %v1731_v5, %v847_v31  ;;  %v917_v51 = vadd.f32 %v1731_v5, %v852_v4 }
 0x1f3   : > { %vm962_vm1 = vcmp.gt.f32.partialorder %v662_v49, %v946_v53  ;;  %v932_v25 = vsub.f32 %v916_v23, %v1563_v40  ;;  %v933_v55 = vsub.f32 %v917_v51, %v665_v9 }
 0x1f4   : > { %vm1771_vm2 = vmpackc.low %vm962_vm1, %vm961_vm0  ;;  %v857_v6 = vpop.permute.xlu1 %856  ;;  %v862_v54 = vpop.permute.xlu0 %861 }
 0x1f5   : > { %v948_v18 = vmul.f32 0.1, %v932_v25  ;;  %v918_v29 = vadd.f32 %v1731_v5, %v857_v6  ;;  %v919_v16 = vadd.f32 %v1731_v5, %v862_v54  ;;  %v949_v27 = vmul.f32 0.1, %v933_v55 }
 0x1f7   : > { %vm964_vm4 = vcmp.gt.f32.partialorder %v1563_v40, %v948_v18  ;;  %v934_v30 = vsub.f32 %v918_v29, %v1653_v43  ;;  %v935_v13 = vsub.f32 %v919_v16, %v667_v48  ;;  %vm965_vm7 = vcmp.gt.f32.partialorder %v665_v9, %v949_v27 }
 0x1f8   : > { %vm978_vm5 = vmpackc.low %vm964_vm4, %vm963_vm3  ;;  %v867_v46 = vpop.permute.xlu1 %866  ;;  %v872_v26 = vpop.permute.xlu0 %871 }
 0x1f9   : > { %vm979_vm6 = vmpackc.even %vm978_vm5, %vm1771_vm2  ;;  %v950_v59 = vmul.f32 0.1, %v934_v30  ;;  %v920_v14 = vadd.f32 %v1731_v5, %v867_v46  ;;  %v921_v0 = vadd.f32 %v1731_v5, %v872_v26  ;;  %v951_v15 = vmul.f32 0.1, %v935_v13 }
 0x1fa   : > { %v989_v57 = vsel %vm979_vm6, 16843009, %v1903_v63 }
 0x1fb   : > { %v993_v40 = vunpack.c.0.s8 %v989_v57  ;;  %v994_v62 = vunpack.c.1.s8 %v989_v57  ;;  %v995_v58 = vunpack.c.2.s8 %v989_v57  ;;  %v996_v36 = vunpack.c.3.s8 %v989_v57 }
 0x1fc   : > { %vm966_vm8 = vcmp.gt.f32.partialorder %v1653_v43, %v950_v59  ;;  %v936_v35 = vsub.f32 %v920_v14, %v1664_v45  ;;  %v937_v32 = vsub.f32 %v921_v0, %v669_v10  ;;  %v877_v24 = vpop.permute.xlu1 %876  ;;  %v882_v22 = vpop.permute.xlu0 %881  ;;  %vm967_vm10 = vcmp.gt.f32.partialorder %v667_v48, %v951_v15 }
 0x1fd   : > { %v1009_v49 = vpack.c.b16 %v993_v40, %v993_v40  ;;  %v1011_v3 = vpack.c.b16 %v994_v62, %v994_v62  ;;  %v1013_v38 = vpack.c.b16 %v995_v58, %v995_v58  ;;  %v1015_v21 = vpack.c.b16 %v996_v36, %v996_v36  ;;  %vm1789_vm9 = vmpackc.low %vm966_vm8, %vm965_vm7 }
 0x1fe   : > { %v952_v43 = vmul.f32 0.1, %v936_v35  ;;  %v922_v60 = vadd.f32 %v1731_v5, %v877_v24  ;;  %v923_v17 = vadd.f32 %v1731_v5, %v882_v22  ;;  %v953_v28 = vmul.f32 0.1, %v937_v32 }
 0x1ff   : > { %v1010_v1 = vpack.c.b8 %v1009_v49, %v1009_v49  ;;  %v1012_v39 = vpack.c.b8 %v1011_v3, %v1011_v3  ;;  %v1014_v7 = vpack.c.b8 %v1013_v38, %v1013_v38  ;;  %v1016_v37 = vpack.c.b8 %v1015_v21, %v1015_v21 }
 0x200   : > { %vm968_vm11 = vcmp.gt.f32.partialorder %v1664_v45, %v952_v43  ;;  %v938_v61 = vsub.f32 %v922_v60, %v1675_v47  ;;  %v939_v31 = vsub.f32 %v923_v17, %v1714_v8  ;;  %v887_v9 = vpop.permute.xlu1 %886  ;;  %v892_v4 = vpop.permute.xlu0 %891  ;;  %vm969_vm14 = vcmp.gt.f32.partialorder %v669_v10, %v953_v28 }
 0x201   : > { %1041 = vst [vmem:[%s1796_s26] sm:$0x3] %v1010_v1  ;;  %1042 = vst [vmem:[%s1796_s26 + $0x2] sm:$0x3] %v1012_v39  ;;  %v924_v53 = vadd.f32 %v1731_v5, %v887_v9  ;;  %v925_v23 = vadd.f32 %v1731_v5, %v892_v4 }
 0x202   : > { %1043 = vst [vmem:[%s1796_s26 + $0x4] sm:$0x3] %v1014_v7  ;;  %1044 = vst [vmem:[%s1796_s26 + $0x6] sm:$0x3] %v1016_v37  ;;  %v954_v45 = vmul.f32 0.1, %v938_v61 }
 0x203   : > { %vm981_vm12 = vmpackc.low %vm968_vm11, %vm967_vm10  ;;  %v955_v44 = vmul.f32 0.1, %v939_v31  ;;  %v940_v2 = vsub.f32 %v924_v53, %v1685_v19  ;;  %v941_v18 = vsub.f32 %v925_v23, %v1722_v20 }
 0x204   : > { %vm982_vm13 = vmpackc.even %vm981_vm12, %vm1789_vm9  ;;  %v897_v50 = vpop.permute.xlu1 %896  ;;  %v902_v6 = vpop.permute.xlu0 %901  ;;  %vm970_vm15 = vcmp.gt.f32.partialorder %v1675_v47, %v954_v45 }
 0x205   : > { %v990_v51 = vsel %vm982_vm13, 16843009, %v1903_v63  ;;  %v956_v54 = vmul.f32 0.1, %v940_v2  ;;  %vm1815_vm0 = vmpackc.low %vm970_vm15, %vm969_vm14  ;;  %vm971_vm1 = vcmp.gt.f32.partialorder %v1714_v8, %v955_v44  ;;  %v926_v47 = vadd.f32 %v1731_v5, %v897_v50 }
 0x206   : > { %v997_v56 = vunpack.c.0.s8 %v990_v51  ;;  %v998_v52 = vunpack.c.1.s8 %v990_v51  ;;  %v999_v25 = vunpack.c.2.s8 %v990_v51  ;;  %v1000_v55 = vunpack.c.3.s8 %v990_v51 }
 0x207   : > { %vm972_vm2 = vcmp.gt.f32.partialorder %v1685_v19, %v956_v54  ;;  %v927_v48 = vadd.f32 %v1731_v5, %v902_v6  ;;  %v942_v14 = vsub.f32 %v926_v47, %v1690_v11  ;;  %v957_v57 = vmul.f32 0.1, %v941_v18 }
 0x208   : > { %v1017_v29 = vpack.c.b16 %v997_v56, %v997_v56  ;;  %v1019_v16 = vpack.c.b16 %v998_v52, %v998_v52  ;;  %v1021_v42 = vpack.c.b16 %v999_v25, %v999_v25  ;;  %v1023_v33 = vpack.c.b16 %v1000_v55, %v1000_v55  ;;  %vm984_vm3 = vmpackc.low %vm972_vm2, %vm971_vm1  ;;  %v907_v59 = vpop.permute.xlu1 %906 }
 0x209   : > { %vm985_vm4 = vmpackc.even %vm984_vm3, %vm1815_vm0  ;;  %v943_v8 = vsub.f32 %v927_v48, %v1724_v12  ;;  %v928_v19 = vadd.f32 %v1731_v5, %v907_v59  ;;  %v958_v36 = vmul.f32 0.1, %v942_v14  ;;  %vm973_vm5 = vcmp.gt.f32.partialorder %v1722_v20, %v957_v57 }
 0x20a   : > { %v1018_v30 = vpack.c.b8 %v1017_v29, %v1017_v29  ;;  %v1020_v13 = vpack.c.b8 %v1019_v16, %v1019_v16  ;;  %v1022_v46 = vpack.c.b8 %v1021_v42, %v1021_v42  ;;  %v1024_v26 = vpack.c.b8 %v1023_v33, %v1023_v33 }
 0x20b   : > { %v991_v0 = vsel %vm985_vm4, 16843009, %v1903_v63  ;;  %v959_v15 = vmul.f32 0.1, %v943_v8  ;;  %v944_v35 = vsub.f32 %v928_v19, %v1692_v34  ;;  %vm974_vm6 = vcmp.gt.f32.partialorder %v1690_v11, %v958_v36 }
 0x20c   : > { %1045 = vst [vmem:[%s1796_s26 + $0x8] sm:$0x3] %v1018_v30  ;;  %1046 = vst [vmem:[%s1796_s26 + $0xa] sm:$0x3] %v1020_v13  ;;  %v1001_v10 = vunpack.c.0.s8 %v991_v0  ;;  %v1002_v40 = vunpack.c.1.s8 %v991_v0  ;;  %v1003_v62 = vunpack.c.2.s8 %v991_v0  ;;  %v1004_v58 = vunpack.c.3.s8 %v991_v0 }
 0x20d   : > { %1047 = vst [vmem:[%s1796_s26 + $0xc] sm:$0x3] %v1022_v46  ;;  %1048 = vst [vmem:[%s1796_s26 + $0xe] sm:$0x3] %v1024_v26  ;;  %v960_v49 = vmul.f32 0.1, %v944_v35  ;;  %vm975_vm8 = vcmp.gt.f32.partialorder %v1724_v12, %v959_v15 }
 0x20e   : > { %v1025_v32 = vpack.c.b16 %v1001_v10, %v1001_v10  ;;  %v1027_v5 = vpack.c.b16 %v1002_v40, %v1002_v40  ;;  %v1029_v24 = vpack.c.b16 %v1003_v62, %v1003_v62  ;;  %v1031_v22 = vpack.c.b16 %v1004_v58, %v1004_v58  ;;  %vm986_vm7 = vmpackc.low %vm974_vm6, %vm973_vm5 }
 0x20f   : > { %vm976_vm9 = vcmp.gt.f32.partialorder %v1692_v34, %v960_v49 }
 0x210   : > { %v1026_v3 = vpack.c.b8 %v1025_v32, %v1025_v32  ;;  %v1028_v38 = vpack.c.b8 %v1027_v5, %v1027_v5  ;;  %v1030_v21 = vpack.c.b8 %v1029_v24, %v1029_v24  ;;  %v1032_v41 = vpack.c.b8 %v1031_v22, %v1031_v22  ;;  %vm987_vm10 = vmpackc.low %vm976_vm9, %vm975_vm8 }
 0x211   : > { %vm988_vm11 = vmpackc.even %vm987_vm10, %vm986_vm7 }
 0x212   : > { %1049 = vst [vmem:[%s1796_s26 + $0x10] sm:$0x3] %v1026_v3  ;;  %1050 = vst [vmem:[%s1796_s26 + $0x12] sm:$0x3] %v1028_v38  ;;  %v992_v11 = vsel %vm988_vm11, 16843009, %v1903_v63 }
 0x213   : > { %1051 = vst [vmem:[%s1796_s26 + $0x14] sm:$0x3] %v1030_v21  ;;  %1052 = vst [vmem:[%s1796_s26 + $0x16] sm:$0x3] %v1032_v41  ;;  %v1005_v20 = vunpack.c.0.s8 %v992_v11  ;;  %v1006_v43 = vunpack.c.1.s8 %v992_v11  ;;  %v1007_v60 = vunpack.c.2.s8 %v992_v11  ;;  %v1008_v17 = vunpack.c.3.s8 %v992_v11 }
 0x215   : > { %v1033_v1 = vpack.c.b16 %v1005_v20, %v1005_v20  ;;  %v1035_v12 = vpack.c.b16 %v1006_v43, %v1006_v43  ;;  %v1037_v39 = vpack.c.b16 %v1007_v60, %v1007_v60  ;;  %v1039_v34 = vpack.c.b16 %v1008_v17, %v1008_v17 }
 0x217   : > { %v1034_v7 = vpack.c.b8 %v1033_v1, %v1033_v1  ;;  %v1036_v37 = vpack.c.b8 %v1035_v12, %v1035_v12  ;;  %v1038_v61 = vpack.c.b8 %v1037_v39, %v1037_v39  ;;  %v1040_v31 = vpack.c.b8 %v1039_v34, %v1039_v34 }
 0x219   : > { %1053 = vst [vmem:[%s1796_s26 + $0x18] sm:$0x3] %v1034_v7  ;;  %1054 = vst [vmem:[%s1796_s26 + $0x1a] sm:$0x3] %v1036_v37 }
 0x21a   : > { %1055 = vst [vmem:[%s1796_s26 + $0x1c] sm:$0x3] %v1038_v61  ;;  %1056 = vst [vmem:[%s1796_s26 + $0x1e] sm:$0x3] %v1040_v31 }
 0x21b PF: > { %s12_s11 = sadd.s32 1, %s1247_s11   ;;  %s1908_s9 = smov %s1243_s10 }
 0x21c   : > { %p9_p5 = scmp.ge.s32.totalorder %s12_s11, 4   ;;  %s1909_s10 = smov %s1911_s12 }
 0x21e   :  { %11 = sbr.rel (!%p9_p5) target bundleno = 2 (0x2), region = 61 }

</bundles_post_ra>
